<compile_context>
chip_gen: v7x
topology: tpu7x:2x2x1
jax: 0.10.0
libtpu: 0.0.40
codegen_flags: <defaults>
</compile_context>

<pallas_src>
import jax
import jax.numpy as jnp
from jax.experimental import pallas as pl
from jax.experimental.pallas import tpu as pltpu


def _make_transition_kernel(mxu_dtype=None):
    def kernel(bn_ref, w_ref, x_ref, o_ref):
        # bn_ref: (2, K)    row 0 = 0.25 * gamma / sqrt(var + eps)
        #                   row 1 = 0.25 * (beta - mean * scale), tiled twice (K = 2*Cin)
        # w_ref:  (K, Cout) 1x1 conv weight row-stacked so the W-pool is part of K
        # x_ref:  (1, tile_h, W/2, K)   NHWC tile, adjacent W pairs folded into channels
        # o_ref:  (1, (tile_h//2)*(W//2), Cout)   lane/sublane-dense output slab
        x = x_ref[0]                                   # (tile_h, Wh, K)
        tile_h, Wh, K = x.shape
        Hh = tile_h // 2

        scale = bn_ref[0:1, :].reshape(1, 1, K)
        shift = bn_ref[1:2, :].reshape(1, 1, K)

        # BatchNorm (avg-pool's 0.25 pre-folded) + ReLU        (VPU, f32 math)
        xn = jnp.maximum(x * scale + shift, 0.0)       # (tile_h, Wh, K)

        # H-pool: sum adjacent row pairs -- leading-dim reshape only, no relayout.
        p = xn.reshape(Hh, 2, Wh, K).sum(axis=1)       # (Hh, Wh, K)

        # 1x1 conv + W-pool as one K = 2*Cin contraction on the MXU.
        a = p.reshape(Hh * Wh, K)                      # (M, K)
        if mxu_dtype is not None:                      # bf16 operands on v6e/v7x
            a = a.astype(mxu_dtype)
        y = jnp.dot(a, w_ref[...], preferred_element_type=jnp.float32)  # (M, Cout)

        o_ref[0] = y.astype(o_ref.dtype)

    return kernel


def _vmem_capacity_bytes():
    try:
        return int(getattr(pltpu.get_tpu_info(), "vmem_capacity_bytes", 128 << 20))
    except Exception:
        return 128 << 20


def _pick_tile_h(N, H, W, Cin, itemsize, budget_bytes):
    """Largest even divisor of H whose input block fits the VMEM budget, preferring
    (a) a sublane-aligned matmul M (or the full image, tile_h == H) and
    (b) >= 2 TOTAL grid steps (N * H/tile_h) so the pipeline / 2nd TensorCore has work."""
    Wh = W // 2
    cands = [d for d in range(2, H + 1, 2) if H % d == 0]
    if not cands:
        return H

    def fits(d):
        return d * W * Cin * itemsize <= budget_bytes

    def aligned(d):                       # matmul M multiple of 8, or full-extent block
        return d == H or ((d // 2) * Wh) % 8 == 0

    def multi(d):                         # at least 2 grid steps in total
        return N * (H // d) >= 2

    for pred in (lambda d: fits(d) and aligned(d) and multi(d),
                 lambda d: fits(d) and aligned(d),
                 lambda d: fits(d) and multi(d),
                 fits):
        sel = [d for d in cands if pred(d)]
        if sel:
            return max(sel)
    return min(cands)


def transition_forward_nhwc(x_nhwc, gamma, beta, w_oihw, *, eps=1e-5,
                            mxu_dtype=None, tile_h=None):
    """NHWC-native forward (no layout transposes)."""
    N, H, W, Cin = x_nhwc.shape
    assert H % 2 == 0 and W % 2 == 0, "AvgPool2d(2) requires even spatial dims"
    Cout = w_oihw.shape[0]
    Wh, K = W // 2, 2 * Cin

    # ---- BatchNorm2d training-mode batch stats: one pass over x, f32 accumulation ----
    # TODO(synk): in a full network, emit these moments as a fused epilogue of the
    # producer layer (or use running stats in eval mode) so x is not re-read from HBM.
    m1 = jnp.mean(x_nhwc, axis=(0, 1, 2), dtype=jnp.float32)                # E[x]
    m2 = jnp.mean(jnp.square(x_nhwc.astype(jnp.float32)), axis=(0, 1, 2))   # E[x^2]
    var = jnp.maximum(m2 - jnp.square(m1), 0.0)                             # biased var
    scale = gamma.astype(jnp.float32) / jnp.sqrt(var + eps)
    shift = beta.astype(jnp.float32) - m1 * scale
    # Fold the avg-pool's 0.25 into the pre-ReLU affine (exact: relu(c*x)=c*relu(x), c>0),
    # then tile to the folded channel axis K = 2*Cin.
    bn = jnp.stack([0.25 * scale, 0.25 * shift])                 # (2, Cin) f32
    bn = jnp.concatenate([bn, bn], axis=1)                       # (2, 2*Cin)

    # 1x1-conv weight in channel-matmul form, row-stacked so the W-pool is absorbed
    # into the K contraction (first Cin rows: even column, last Cin rows: odd column).
    w_mat = w_oihw[:, :, 0, 0].T                                 # (Cin, Cout)
    w2 = jnp.concatenate([w_mat, w_mat], axis=0)                 # (2*Cin, Cout)
    w2 = w2.astype(mxu_dtype if mxu_dtype is not None else jnp.float32)

    # Free metadata reshape on the contiguous NHWC array: adjacent W pairs -> channels.
    x_view = x_nhwc.reshape(N, H, Wh, K)

    itemsize = jnp.dtype(x_nhwc.dtype).itemsize
    vmem_cap = _vmem_capacity_bytes()                            # 128 MiB v5e/v6e, 64 MiB v7x
    if tile_h is None:
        tile_h = _pick_tile_h(N, H, W, Cin, itemsize,
                              budget_bytes=min(16 << 20, vmem_cap // 8))
    assert H % tile_h == 0 and tile_h % 2 == 0
    tile_m = (tile_h // 2) * Wh

    in_blk = tile_h * Wh * K * itemsize
    out_blk = tile_m * Cout * itemsize
    params = (2 * K + K * Cout) * 4
    # double-buffered in/out blocks + in-kernel f32 temporaries + params + headroom,
    # capped at 3/4 of physical VMEM (96 MiB on v5e/v6e, 48 MiB on v7x).
    need = 2 * (in_blk + out_blk) + 3 * in_blk + params + (2 << 20)
    vmem_limit = int(min(max(need, 32 << 20), (vmem_cap * 3) // 4))

    out = pl.pallas_call(
        _make_transition_kernel(mxu_dtype),
        out_shape=jax.ShapeDtypeStruct((N, (H // 2) * Wh, Cout), x_nhwc.dtype),
        grid=(N, H // tile_h),
        in_specs=[
            # Constant index_maps -> BN params / weight stay VMEM-resident across steps.
            pl.BlockSpec((2, K), lambda n, h: (0, 0)),
            pl.BlockSpec((K, Cout), lambda n, h: (0, 0)),
            pl.BlockSpec((1, tile_h, Wh, K), lambda n, h: (n, h, 0, 0)),
        ],
        out_specs=pl.BlockSpec((1, tile_m, Cout), lambda n, h: (n, h, 0)),
        compiler_params=pltpu.CompilerParams(
            dimension_semantics=("parallel", "parallel"),
            vmem_limit_bytes=vmem_limit,
        ),
    )(bn, w2, x_view)

    return out.reshape(N, H // 2, Wh, Cout)                      # free metadata reshape


def transition_forward(x_nchw, gamma, beta, w_oihw, *, eps=1e-5, mxu_dtype=None):
    """Forward pass matching PyTorch Transition(in_c, out_c) in default (training) mode.

    Public interface is NCHW to match PyTorch.  For an NHWC end-to-end model, call
    `transition_forward_nhwc` directly and skip both transposes (each is a full HBM
    read+write of the activation on a memory-bound op).
    """
    x = jnp.transpose(x_nchw, (0, 2, 3, 1))                      # NCHW -> NHWC
    out = transition_forward_nhwc(x, gamma, beta, w_oihw, eps=eps, mxu_dtype=mxu_dtype)
    return jnp.transpose(out, (0, 3, 1, 2))                      # NHWC -> NCHW


def transition_reference(x, gamma, beta, w_oihw, *, eps=1e-5):
    """Pure-JAX reference replicating the PyTorch module semantics (NCHW)."""
    mean = x.mean(axis=(0, 2, 3), keepdims=True)
    var = ((x - mean) ** 2).mean(axis=(0, 2, 3), keepdims=True)
    xn = (x - mean) / jnp.sqrt(var + eps) * gamma[None, :, None, None] \
        + beta[None, :, None, None]
    xr = jnp.maximum(xn, 0.0)
    y = jnp.einsum('oi,nihw->nohw', w_oihw[:, :, 0, 0], xr)
    N, Co, H, W = y.shape
    return y.reshape(N, Co, H // 2, 2, W // 2, 2).mean(axis=(3, 5))


if __name__ == "__main__":
    # Small shapes consistent with the module: Transition(in_channels=8, out_channels=4).
    # Real DenseNet transitions (Cin/Cout >= 128, H/W in {56,28,14}) use the same code
    # with lane-dense channel blocks and a much fuller MXU.
    N, Cin, Cout, H, W = 2, 8, 4, 16, 16

    key = jax.random.PRNGKey(0)
    kx, kw, kg, kb = jax.random.split(key, 4)
    x = jax.random.normal(kx, (N, Cin, H, W), dtype=jnp.float32)
    w = 0.1 * jax.random.normal(kw, (Cout, Cin, 1, 1), dtype=jnp.float32)
    gamma = 1.0 + 0.1 * jax.random.normal(kg, (Cin,), dtype=jnp.float32)
    beta = 0.1 * jax.random.normal(kb, (Cin,), dtype=jnp.float32)

    fwd = jax.jit(transition_forward)          # jit fuses the one-pass stats over x
    out = jax.block_until_ready(fwd(x, gamma, beta, w))

    ref = transition_reference(x, gamma, beta, w)
    assert out.shape == (N, Cout, H // 2, W // 2), out.shape
    assert jnp.allclose(out, ref, atol=1e-4, rtol=1e-4), \
        float(jnp.max(jnp.abs(out - ref)))

    print("KERNEL_OK")
</pallas_src>

<mosaic_0001>
module attributes {stable_mosaic.version = 11 : i64} {
  func.func @kernel(%arg0: i32, %arg1: i32, %arg2: memref<2x16xf32, #tpu.memory_space<vmem>>, %arg3: memref<16x4xf32, #tpu.memory_space<vmem>>, %arg4: memref<1x16x8x16xf32, #tpu.memory_space<vmem>>, %arg5: memref<1x64x4xf32, #tpu.memory_space<vmem>>) attributes {dimension_semantics = [#tpu.dimension_semantics<parallel>, #tpu.dimension_semantics<parallel>], iteration_bounds = array<i64: 2, 1>, scalar_prefetch = 0 : i64, scratch_operands = 0 : i64, tpu.core_type = #tpu.core_type<tc>, window_params = [{pipeline_mode = #tpu.pipeline_mode<synchronous>, transform_indices = @transform_0, window_bounds = array<i64: 2, 16>}, {pipeline_mode = #tpu.pipeline_mode<synchronous>, transform_indices = @transform_1, window_bounds = array<i64: 16, 4>}, {transform_indices = @transform_2, window_bounds = array<i64: 1, 16, 8, 16>}, {transform_indices = @transform_3, window_bounds = array<i64: 1, 64, 4>}]} {
    %c0 = arith.constant 0 : index
    %c0_0 = arith.constant 0 : index
    %c0_1 = arith.constant 0 : index
    %c0_2 = arith.constant 0 : index
    %0 = vector.load %arg4[%c0, %c0_0, %c0_1, %c0_2] : memref<1x16x8x16xf32, #tpu.memory_space<vmem>>, vector<1x16x8x16xf32>
    %1 = vector.shape_cast %0 : vector<1x16x8x16xf32> to vector<16x8x16xf32>
    %c0_3 = arith.constant 0 : index
    %c0_4 = arith.constant 0 : index
    %2 = vector.load %arg2[%c0_3, %c0_4] : memref<2x16xf32, #tpu.memory_space<vmem>>, vector<1x16xf32>
    %3 = vector.shape_cast %2 : vector<1x16xf32> to vector<1x1x16xf32>
    %c1 = arith.constant 1 : index
    %c0_5 = arith.constant 0 : index
    %4 = vector.load %arg2[%c1, %c0_5] : memref<2x16xf32, #tpu.memory_space<vmem>>, vector<1x16xf32>
    %5 = vector.shape_cast %4 : vector<1x16xf32> to vector<1x1x16xf32>
    %6 = vector.broadcast %3 : vector<1x1x16xf32> to vector<16x8x16xf32>
    %7 = arith.mulf %1, %6 : vector<16x8x16xf32>
    %8 = vector.broadcast %5 : vector<1x1x16xf32> to vector<16x8x16xf32>
    %9 = arith.addf %7, %8 : vector<16x8x16xf32>
    %cst = arith.constant 0.000000e+00 : f32
    %10 = vector.broadcast %cst : f32 to vector<16x8x16xf32>
    %11 = arith.maximumf %9, %10 : vector<16x8x16xf32>
    %12 = vector.shape_cast %11 : vector<16x8x16xf32> to vector<8x2x8x16xf32>
    %cst_6 = arith.constant dense<0.000000e+00> : vector<8x8x16xf32>
    %13 = vector.multi_reduction <add>, %12, %cst_6 [1] : vector<8x2x8x16xf32> to vector<8x8x16xf32>
    %14 = vector.shape_cast %13 : vector<8x8x16xf32> to vector<64x16xf32>
    %c0_7 = arith.constant 0 : index
    %c0_8 = arith.constant 0 : index
    %15 = vector.load %arg3[%c0_7, %c0_8] : memref<16x4xf32, #tpu.memory_space<vmem>>, vector<16x4xf32>
    %cst_9 = arith.constant dense<0.000000e+00> : vector<64x4xf32>
    %16 = tpu.matmul %14, %15, %cst_9 {dimension_numbers = #tpu.dot_dimension_numbers<[1], [0], [0], [1], [0, 0, 1, 1], [], []>} : vector<64x16xf32>, vector<16x4xf32>, vector<64x4xf32> -> vector<64x4xf32>
    %c0_10 = arith.constant 0 : index
    %c0_11 = arith.constant 0 : index
    %c0_12 = arith.constant 0 : index
    %17 = vector.load %arg5[%c0_10, %c0_11, %c0_12] : memref<1x64x4xf32, #tpu.memory_space<vmem>>, vector<1x64x4xf32>
    %18 = vector.shape_cast %17 : vector<1x64x4xf32> to vector<64x4xf32>
    %19 = vector.shape_cast %16 : vector<64x4xf32> to vector<1x64x4xf32>
    tpu.vector_store %arg5[%c0_10, %c0_11, %c0_12], %19 {strides = array<i32>} : memref<1x64x4xf32, #tpu.memory_space<vmem>>, vector<1x64x4xf32>,
    return
  }
  func.func @transform_0(%arg0: i32, %arg1: i32) -> (i32, i32) {
    %c0_i32 = arith.constant 0 : i32
    %c0_i32_0 = arith.constant 0 : i32
    %c0_i32_1 = arith.constant 0 : i32
    return %c0_i32, %c0_i32_0 : i32, i32
  }
  func.func @transform_1(%arg0: i32, %arg1: i32) -> (i32, i32) {
    %c0_i32 = arith.constant 0 : i32
    %c0_i32_0 = arith.constant 0 : i32
    %c0_i32_1 = arith.constant 0 : i32
    return %c0_i32, %c0_i32_0 : i32, i32
  }
  func.func @transform_2(%arg0: i32, %arg1: i32) -> (i32, i32, i32, i32) {
    %c0_i32 = arith.constant 0 : i32
    %c0_i32_0 = arith.constant 0 : i32
    %c0_i32_1 = arith.constant 0 : i32
    return %arg0, %arg1, %c0_i32, %c0_i32_0 : i32, i32, i32, i32
  }
  func.func @transform_3(%arg0: i32, %arg1: i32) -> (i32, i32, i32) {
    %c0_i32 = arith.constant 0 : i32
    %c0_i32_0 = arith.constant 0 : i32
    return %arg0, %arg1, %c0_i32 : i32, i32, i32
  }
}

</mosaic_0001>

<bundles_post_ra>
// kernel: transition_forward.1
= control target key start
LH: loop header
LB: loop body
LE: loop exit
PB: predicated region body
PF: predicated region fallthrough
CT: control target
= control target key end

     0   :  { %s659_s12 = smov 0   ;;  %s661_s13 = smov 0   ;;  %s794_s0 = inlined_call_operand.vmem [shape: f32[2,16], index: 0, kind: input, shape index: {}]   ;;  %s795_s1 = inlined_call_operand.vmem [shape: f32[16,4], index: 1, kind: input, shape index: {}]   ;;  %s796_s2 = inlined_call_operand.vmem [shape: f32[2,16,8,16], index: 2, kind: input, shape index: {}]   ;;  %s797_s3 = inlined_call_operand.vmem [shape: f32[2,64,4], index: 3, kind: output, shape index: {}]  }
   0x1   :  { %s663_s14 = smov 0  }
   0x2 LB: > { %s25_s15 = sadd.s32 1, %s633_s13  ;;  %p540_p0 = scmp.ge.s32.totalorder %s637_s14, 1  ;;  %s637_s14 = sphi %s663_s14, %s13_s14   ;;  %s633_s13 = sphi %s661_s13, %s799_s13   ;;  %s629_s12 = sphi %s659_s12, %s798_s12  }
   0x3   : > { %p27_p1 = scmp.ge.s32.totalorder %s25_s15, 2  ;;  %p158_p2 = scmp.lt.s32.totalorder %s637_s14, 3 }
   0x5   : > { %s801_s15 = smov (%p27_p1, %s25_s15), 0  ;;  %p159_p3 = pnand %p540_p0, %p158_p2 }
   0x6   : > { %v309_v0 = vld [vmem:[%s795_s1] sm:$0xff] (!%p159_p3)  ;;  %v310_v1 = vld [vmem:[%s795_s1 + $0x8] sm:$0xff] (!%p159_p3)  ;;  %p191_p4 = scmp.lt.s32.totalorder (!%p159_p3), %s629_s12, 1  ;;  %vm284_vm0 = vcmask (!%p159_p3), 130048   ;;  %vm440_vm1 = vcmask (!%p159_p3), 31744  }
   0x7   : > { %162 = sbr.rel (%p159_p3) target bundleno = 254 (0xfe), region = 32  ;;  %v585_v2 = vpack.c.bf16 (!%p159_p3), %v310_v1, %v309_v0  ;;  %v689_v3 = vld [vmem:[%s794_s0] ss:$0 sm:$0xff] (!%p159_p3)  ;;  %v699_v4 = vld [vmem:[%s794_s0 + $0x1] ss:$0 sm:$0xff] (!%p159_p3) }
   0x9   : > { %586 = vmatprep.subr.bf16.mxu0 (!%p159_p3), %v585_v2  ;;  %589 = vmatprep.subr.bf16.mxu1 (!%p159_p3), %v585_v2 }
   0xa   : > { %588 = vmatpush3.bf16.msra.mxu0 (!%p159_p3), %v585_v2  ;;  %590 = vmatpush3.bf16.msra.mxu1 (!%p159_p3), %v585_v2 }
   0xe   : > { %s803_s12 = smov (!%p191_p4, %s629_s12), 1 }
   0xf   : > { %s557_s20 = sshll.u32 %s803_s12, 7  ;;  %s558_s28 = sshll.u32 %s803_s12, 6 }
  0x10   : > { %s694_s25 = scalar_lea.vmem %s796_s2, %s557_s20  ;;  %s208_s4 = scalar_lea.vmem %s797_s3, %s558_s28 }
  0x11   : > { %v210_v5 = vld [vmem:[%s694_s25] sm:$0xff]  ;;  %v211_v6 = vld [vmem:[%s694_s25 + $0x8] sm:$0xff]  ;;  %v212_v12 = vld [vmem:[%s694_s25 + $0x10] sm:$0xff] }
  0x12   : > { %v218_v7 = vld [vmem:[%s694_s25 + $0x40] sm:$0xff]  ;;  %v232_v8 = vmul.f32 %v689_v3, %v210_v5  ;;  %v233_v9 = vmul.f32 %v689_v3, %v211_v6  ;;  %v219_v10 = vld [vmem:[%s694_s25 + $0x48] sm:$0xff]  ;;  %v213_v13 = vld [vmem:[%s694_s25 + $0x18] sm:$0xff]  ;;  %v234_v15 = vmul.f32 %v689_v3, %v212_v12 }
  0x13   : > { %v240_v11 = vmul.f32 %v689_v3, %v218_v7  ;;  %v241_v14 = vmul.f32 %v689_v3, %v219_v10  ;;  %v235_v16 = vmul.f32 %v689_v3, %v213_v13  ;;  %v220_v17 = vld [vmem:[%s694_s25 + $0x50] sm:$0xff]  ;;  %v221_v18 = vld [vmem:[%s694_s25 + $0x58] sm:$0xff]  ;;  %v214_v35 = vld [vmem:[%s694_s25 + $0x20] sm:$0xff] }
  0x14   : > { %v252_v19 = vadd.f32 %v699_v4, %v232_v8  ;;  %v253_v20 = vadd.f32 %v699_v4, %v233_v9  ;;  %v242_v22 = vmul.f32 %v689_v3, %v220_v17  ;;  %v254_v24 = vadd.f32 %v699_v4, %v234_v15  ;;  %v215_v36 = vld [vmem:[%s694_s25 + $0x28] sm:$0xff]  ;;  %v222_v41 = vld [vmem:[%s694_s25 + $0x60] sm:$0xff]  ;;  %v216_v47 = vld [vmem:[%s694_s25 + $0x30] sm:$0xff] }
  0x15   : > { %v260_v21 = vadd.f32 %v699_v4, %v240_v11  ;;  %v261_v23 = vadd.f32 %v699_v4, %v241_v14  ;;  %v255_v25 = vadd.f32 %v699_v4, %v235_v16  ;;  %v243_v26 = vmul.f32 %v689_v3, %v221_v18  ;;  %v223_v42 = vld [vmem:[%s694_s25 + $0x68] sm:$0xff]  ;;  %v217_v48 = vld [vmem:[%s694_s25 + $0x38] sm:$0xff]  ;;  %v224_v49 = vld [vmem:[%s694_s25 + $0x70] sm:$0xff] }
  0x16   : > { %v268_v27 = vmax.f32 %v252_v19, 0.0  ;;  %v269_v28 = vmax.f32 %v253_v20, 0.0  ;;  %v262_v30 = vadd.f32 %v699_v4, %v242_v22  ;;  %v270_v32 = vmax.f32 %v254_v24, 0.0  ;;  %v225_v58 = vld [vmem:[%s694_s25 + $0x78] sm:$0xff] }
  0x17   : > { %v276_v29 = vmax.f32 %v260_v21, 0.0  ;;  %v277_v31 = vmax.f32 %v261_v23, 0.0  ;;  %v271_v33 = vmax.f32 %v255_v25, 0.0  ;;  %v263_v34 = vadd.f32 %v699_v4, %v243_v26 }
  0x18   : > { %v285_v37 = vsel %vm284_vm0, %v268_v27, 0.0  ;;  %v286_v38 = vsel %vm284_vm0, %v269_v28, 0.0  ;;  %v278_v40 = vmax.f32 %v262_v30, 0.0  ;;  %v288_v45 = vsel %vm284_vm0, %v270_v32, 0.0 }
  0x19   : > { %v297_v39 = vsel %vm284_vm0, %v276_v29, 0.0  ;;  %v287_v43 = vadd.f32 %v286_v38, %v285_v37  ;;  %v298_v44 = vsel %vm284_vm0, %v277_v31, 0.0  ;;  %v289_v46 = vsel %vm284_vm0, %v271_v33, 0.0 }
  0x1a   : > { %v299_v50 = vadd.f32 %v298_v44, %v297_v39  ;;  %v290_v51 = vadd.f32 %v289_v46, %v288_v45  ;;  %v279_v52 = vmax.f32 %v263_v34, 0.0  ;;  %v300_v53 = vsel %vm284_vm0, %v278_v40, 0.0 }
  0x1b   : > { %573 = vmatprep.mubr.msk.f32.mxu0 %vm284_vm0, %v287_v43  ;;  %v236_v54 = vmul.f32 %v689_v3, %v214_v35  ;;  %v237_v55 = vmul.f32 %v689_v3, %v215_v36  ;;  %v244_v56 = vmul.f32 %v689_v3, %v222_v41  ;;  %v245_v57 = vmul.f32 %v689_v3, %v223_v42 }
  0x1c   : > { %579 = vmatprep.mubr.msk.f32.mxu1 %vm284_vm0, %v299_v50  ;;  %574 = vmatmul.mubr.msk.f32.vlgmr.msra.gmra.mrb[0].mxu0 %vm284_vm0, %v290_v51  ;;  %v301_v59 = vsel %vm284_vm0, %v279_v52, 0.0  ;;  %v238_v60 = vmul.f32 %v689_v3, %v216_v47  ;;  %v239_v61 = vmul.f32 %v689_v3, %v217_v48  ;;  %v246_v62 = vmul.f32 %v689_v3, %v224_v49 }
  0x1d   : > { %v302_v63 = vadd.f32 %v301_v59, %v300_v53  ;;  %v256_v0 = vadd.f32 %v699_v4, %v236_v54  ;;  %v257_v1 = vadd.f32 %v699_v4, %v237_v55  ;;  %v264_v2 = vadd.f32 %v699_v4, %v244_v56 }
  0x1e   : > { %v265_v5 = vadd.f32 %v699_v4, %v245_v57  ;;  %v258_v6 = vadd.f32 %v699_v4, %v238_v60  ;;  %v259_v7 = vadd.f32 %v699_v4, %v239_v61  ;;  %v247_v8 = vmul.f32 %v689_v3, %v225_v58 }
  0x1f   : > { %580 = vmatmul.mubr.msk.f32.vlgmr.msra.gmra.mrb[0].mxu1 %vm284_vm0, %v302_v63  ;;  %v272_v9 = vmax.f32 %v256_v0, 0.0  ;;  %v273_v10 = vmax.f32 %v257_v1, 0.0  ;;  %v280_v11 = vmax.f32 %v264_v2, 0.0  ;;  %v266_v12 = vadd.f32 %v699_v4, %v246_v62 }
  0x20   : > { %v281_v13 = vmax.f32 %v265_v5, 0.0  ;;  %v274_v14 = vmax.f32 %v258_v6, 0.0  ;;  %v275_v15 = vmax.f32 %v259_v7, 0.0  ;;  %v267_v16 = vadd.f32 %v699_v4, %v247_v8 }
  0x21   : > { %v291_v17 = vsel %vm284_vm0, %v272_v9, 0.0  ;;  %v292_v18 = vsel %vm284_vm0, %v273_v10, 0.0  ;;  %v303_v19 = vsel %vm284_vm0, %v280_v11, 0.0  ;;  %v282_v3 = vmax.f32 %v266_v12, 0.0 }
  0x22   : > { %v293_v20 = vadd.f32 %v292_v18, %v291_v17  ;;  %v304_v21 = vsel %vm284_vm0, %v281_v13, 0.0  ;;  %v294_v22 = vsel %vm284_vm0, %v274_v14, 0.0  ;;  %v295_v23 = vsel %vm284_vm0, %v275_v15, 0.0 }
  0x23   : > { %v305_v24 = vadd.f32 %v304_v21, %v303_v19  ;;  %v296_v25 = vadd.f32 %v295_v23, %v294_v22  ;;  %v283_v26 = vmax.f32 %v267_v16, 0.0  ;;  %v306_v4 = vsel %vm284_vm0, %v282_v3, 0.0 }
  0x24   : > { %576 = vmatprep.mubr.msk.f32.mxu0 %vm284_vm0, %v293_v20 }
  0x25   : > { %582 = vmatprep.mubr.msk.f32.mxu1 %vm284_vm0, %v305_v24  ;;  %577 = vmatmul.mubr.msk.f32.gmra.mrb[2].mxu0 %vm284_vm0, %v296_v25  ;;  %v307_v27 = vsel %vm284_vm0, %v283_v26, 0.0 }
  0x26   : > { %v308_v28 = vadd.f32 %v307_v27, %v306_v4 }
  0x28   : > { %583 = vmatmul.mubr.msk.f32.gmra.mrb[2].mxu1 %vm284_vm0, %v308_v28 }
  0xef   : > { %v575_v29 = vpop.f32.mrb[0].mxu0 }
  0xf0   : > { %442 = vst.msk [vmem:[%s208_s4 + $0x8] sm:$0xff] %vm440_vm1, %v575_v29  ;;  %v401_v30 = vpop.f32.mrb[1].mxu0 }
  0xf1   : > { %441 = vst.msk [vmem:[%s208_s4] sm:$0xff] %vm440_vm1, %v401_v30 }
  0xf2   : > { %v581_v31 = vpop.f32.mrb[0].mxu1 }
  0xf3   : > { %446 = vst.msk [vmem:[%s208_s4 + $0x28] sm:$0xff] %vm440_vm1, %v581_v31  ;;  %v421_v32 = vpop.f32.mrb[1].mxu1 }
  0xf4   : > { %445 = vst.msk [vmem:[%s208_s4 + $0x20] sm:$0xff] %vm440_vm1, %v421_v32 }
  0xf8   : > { %v578_v33 = vpop.f32.mrb[2].mxu0 }
  0xf9   : > { %444 = vst.msk [vmem:[%s208_s4 + $0x18] sm:$0xff] %vm440_vm1, %v578_v33  ;;  %v411_v34 = vpop.f32.mrb[3].mxu0 }
  0xfa   : > { %443 = vst.msk [vmem:[%s208_s4 + $0x10] sm:$0xff] %vm440_vm1, %v411_v34 }
  0xfb   : > { %v584_v35 = vpop.f32.mrb[2].mxu1 }
  0xfc   : > { %448 = vst.msk [vmem:[%s208_s4 + $0x38] sm:$0xff] %vm440_vm1, %v584_v35  ;;  %v431_v36 = vpop.f32.mrb[3].mxu1 }
  0xfd   : > { %447 = vst.msk [vmem:[%s208_s4 + $0x30] sm:$0xff] %vm440_vm1, %v431_v36 }
  0xfe PF: > { %s13_s14 = sadd.s32 1, %s637_s14   ;;  %s798_s12 = smov %s633_s13 }
  0xff   : > { %p10_p5 = scmp.ge.s32.totalorder %s13_s14, 4   ;;  %s799_s13 = smov %s801_s15 }
 0x101   :  { %12 = sbr.rel (!%p10_p5) target bundleno = 2 (0x2), region = 62 }

</bundles_post_ra>
